<compile_context>
chip_gen: v5e
topology: v5e:2x2
jax: 0.10.0
libtpu: 0.0.40
codegen_flags: <defaults>
</compile_context>

<pallas_src>
import functools

import jax
import jax.numpy as jnp
from jax.experimental import pallas as pl
from jax.experimental.pallas import tpu as pltpu


def _round_up(x, m):
    return ((x + m - 1) // m) * m


def gcn_kernel(adj_ref, feat_hi_ref, feat_lo_ref, inv_deg_ref, w_ref, b_ref,
               out_ref, acc_ref):
    k = pl.program_id(1)

    @pl.when(k == 0)
    def _():
        acc_ref[...] = jnp.zeros_like(acc_ref)

    # int8 0/1 -> bf16 (exact); feed the MXU bf16 directly, accumulate in f32.
    adj = adj_ref[...].astype(jnp.bfloat16)                       # [tm, tk]
    acc_ref[...] += (
        jnp.dot(adj, feat_hi_ref[...], preferred_element_type=jnp.float32)
        + jnp.dot(adj, feat_lo_ref[...], preferred_element_type=jnp.float32)
    )

    @pl.when(k == pl.num_programs(1) - 1)
    def _():
        # mean over in-neighbors (0 for isolated nodes), then fused Linear.
        h = acc_ref[...] * inv_deg_ref[...]                       # [tm, F_in]
        out_ref[...] = (
            jnp.dot(h, w_ref[...], preferred_element_type=jnp.float32)
            + b_ref[...]
        )


def gcn_preprocess(adj, *, tm=512, tk=4096):
    """One-time graph preprocessing (hoist out of the per-call hot path).

    adj: [N, N] dense 0/1 adjacency (any float/int dtype, values must be 0/1).
    Returns a dict with the padded int8 adjacency, padded 1/in_degree column,
    the [N,1] constraint scale, and the tiling parameters.
    """
    n = adj.shape[0]
    adj_f32 = adj.astype(jnp.float32)

    deg = jnp.sum(adj_f32, axis=-1, keepdims=True)                # [N,1] exact
    scale = 1.0 / jnp.sqrt(deg + 1.0)                             # constraint
    inv_deg = jnp.where(deg > 0, 1.0 / deg, 0.0)                  # mean (0 if isolated)

    # Clamp tiles to the (128-aligned) node count; if the whole source axis
    # fits one tile, the reduction grid axis collapses to a single step.
    n128 = _round_up(n, 128)
    tm = min(tm, n128)
    tk = min(tk, n128)
    n_dst = _round_up(n, tm)
    n_src = _round_up(n, tk)

    # Padding is zero: padded sources contribute nothing, padded dests sliced.
    adj_i8 = jnp.zeros((n_dst, n_src), jnp.int8)
    adj_i8 = adj_i8.at[:n, :n].set(adj_f32.astype(jnp.int8))
    invd_p = jnp.zeros((n_dst, 1), jnp.float32).at[:n, :].set(inv_deg)

    return dict(adj_i8=adj_i8, inv_deg_p=invd_p, scale=scale,
                n=n, tm=tm, tk=tk, n_dst=n_dst, n_src=n_src)


@functools.partial(jax.jit, static_argnames=("n", "tm", "tk", "n_dst", "n_src"))
def _gcn_call(adj_i8, inv_deg_p, scale, feat, w_t, b,
              *, n, tm, tk, n_dst, n_src):
    f_in = feat.shape[1]
    f_out = w_t.shape[1]
    f_out_p = _round_up(f_out, 128)                               # lane-dense output

    # Pre-apply the constraint scale, then split into bf16 hi/lo so two bf16
    # MXU passes reproduce the f32 aggregation to ~f32 accuracy.
    feat_scaled = feat.astype(jnp.float32) * scale                # [N, F_in]
    fs_p = jnp.zeros((n_src, f_in), jnp.float32).at[:n, :].set(feat_scaled)
    feat_hi = fs_p.astype(jnp.bfloat16)
    feat_lo = (fs_p - feat_hi.astype(jnp.float32)).astype(jnp.bfloat16)

    w_p = jnp.zeros((f_in, f_out_p), jnp.float32).at[:, :f_out].set(
        w_t.astype(jnp.float32))
    b_p = jnp.zeros((1, f_out_p), jnp.float32).at[:, :f_out].set(
        jnp.reshape(b, (1, f_out)).astype(jnp.float32))

    grid = (n_dst // tm, n_src // tk)

    cost = pl.CostEstimate(
        flops=2 * (2 * n_dst * n_src * f_in) + 2 * n_dst * f_in * f_out_p,
        transcendentals=0,
        bytes_accessed=(adj_i8.size                               # int8
                        + grid[0] * (feat_hi.size + feat_lo.size) * 2
                        + (inv_deg_p.size + w_p.size + b_p.size) * 4
                        + n_dst * f_out_p * 4),
    )

    out_p = pl.pallas_call(
        gcn_kernel,
        out_shape=jax.ShapeDtypeStruct((n_dst, f_out_p), jnp.float32),
        grid_spec=pltpu.PrefetchScalarGridSpec(
            num_scalar_prefetch=0,
            grid=grid,
            in_specs=[
                pl.BlockSpec((tm, tk), lambda i, k: (i, k)),          # adj (int8)
                pl.BlockSpec((tk, f_in), lambda i, k: (k, 0)),        # feat hi (bf16)
                pl.BlockSpec((tk, f_in), lambda i, k: (k, 0)),        # feat lo (bf16)
                pl.BlockSpec((tm, 1), lambda i, k: (i, 0)),           # dst 1/in_degree
                pl.BlockSpec((f_in, f_out_p), lambda i, k: (0, 0)),   # W (pre-transposed)
                pl.BlockSpec((1, f_out_p), lambda i, k: (0, 0)),      # bias
            ],
            out_specs=pl.BlockSpec((tm, f_out_p), lambda i, k: (i, 0)),
            scratch_shapes=[pltpu.VMEM((tm, f_in), jnp.float32)],     # agg accumulator
        ),
        compiler_params=pltpu.CompilerParams(
            dimension_semantics=("parallel", "arbitrary"),
            vmem_limit_bytes=32 * 1024 * 1024,
        ),
        cost_estimate=cost,
    )(adj_i8, feat_hi, feat_lo, inv_deg_p, w_p, b_p)

    return out_p[:n, :f_out]


def gcn_forward(graph, feat, w_t, b):
    """graph: output of gcn_preprocess; feat: [N,F_in]; w_t: [F_in,F_out]; b: [F_out]."""
    return _gcn_call(graph["adj_i8"], graph["inv_deg_p"], graph["scale"],
                     feat, w_t, b,
                     n=graph["n"], tm=graph["tm"], tk=graph["tk"],
                     n_dst=graph["n_dst"], n_src=graph["n_src"])


def reference_forward(adj, feat, w_t, b):
    deg = jnp.sum(adj, axis=-1, keepdims=True)
    feat = feat / jnp.sqrt(deg + 1.0)
    agg = adj @ feat
    h = jnp.where(deg > 0, agg / jnp.maximum(deg, 1.0), 0.0)
    return h @ w_t + b


if __name__ == "__main__":
    key = jax.random.PRNGKey(0)
    k_adj, k_feat, k_w, k_b = jax.random.split(key, 4)

    N = 200          # number of graph nodes (padded to 256 inside preprocess)
    IN_FEATS = 8
    OUT_FEATS = 32

    # deterministic random sparse-ish graph as dense adjacency, no self loops
    adj = (jax.random.uniform(k_adj, (N, N)) < 0.05).astype(jnp.float32)
    adj = adj * (1.0 - jnp.eye(N, dtype=jnp.float32))
    adj = adj.at[0, :].set(0.0)      # force an isolated node (zero in-degree path)

    feature = jax.random.normal(k_feat, (N, IN_FEATS), dtype=jnp.float32)

    # nn.Linear(in_feats, out_feats): W ~ U(-1/sqrt(in), 1/sqrt(in)), b likewise
    bound = 1.0 / (IN_FEATS ** 0.5)
    w = jax.random.uniform(k_w, (OUT_FEATS, IN_FEATS), minval=-bound, maxval=bound)
    b = jax.random.uniform(k_b, (OUT_FEATS,), minval=-bound, maxval=bound)

    w_t = w.T.astype(jnp.float32)                    # [IN_FEATS, OUT_FEATS]
    b2 = b.reshape(1, OUT_FEATS).astype(jnp.float32)

    # small tiles in the demo so the (dst, src) grid is actually exercised: 2x2
    graph = gcn_preprocess(adj, tm=128, tk=128)
    out = gcn_forward(graph, feature, w_t, b2)
    out = jax.block_until_ready(out)

    ref = reference_forward(adj, feature, w_t, b2)
    assert out.shape == (N, OUT_FEATS)
    assert jnp.allclose(out, ref, atol=1e-4, rtol=1e-4), float(
        jnp.max(jnp.abs(out - ref)))

    print("KERNEL_OK")
</pallas_src>

<mosaic_0001>
module attributes {stable_mosaic.version = 11 : i64} {
  func.func @gcn_kernel(%arg0: i32, %arg1: i32, %arg2: memref<128x128xi8, #tpu.memory_space<vmem>>, %arg3: memref<128x8xbf16, #tpu.memory_space<vmem>>, %arg4: memref<128x8xbf16, #tpu.memory_space<vmem>>, %arg5: memref<128x1xf32, #tpu.memory_space<vmem>>, %arg6: memref<8x128xf32, #tpu.memory_space<vmem>>, %arg7: memref<1x128xf32, #tpu.memory_space<vmem>>, %arg8: memref<128x128xf32, #tpu.memory_space<vmem>>, %arg9: memref<128x8xf32, #tpu.memory_space<vmem>>) attributes {dimension_semantics = [#tpu.dimension_semantics<parallel>, #tpu.dimension_semantics<arbitrary>], iteration_bounds = array<i64: 2, 2>, scalar_prefetch = 0 : i64, scratch_operands = 1 : i64, tpu.core_type = #tpu.core_type<tc>, window_params = [{transform_indices = @transform_0, window_bounds = array<i64: 128, 128>}, {transform_indices = @transform_1, window_bounds = array<i64: 128, 8>}, {transform_indices = @transform_2, window_bounds = array<i64: 128, 8>}, {transform_indices = @transform_3, window_bounds = array<i64: 128, 1>}, {pipeline_mode = #tpu.pipeline_mode<synchronous>, transform_indices = @transform_4, window_bounds = array<i64: 8, 128>}, {pipeline_mode = #tpu.pipeline_mode<synchronous>, transform_indices = @transform_5, window_bounds = array<i64: 1, 128>}, {transform_indices = @transform_6, window_bounds = array<i64: 128, 128>}]} {
    %c0_i32 = arith.constant 0 : i32
    %0 = arith.cmpi eq, %arg1, %c0_i32 : i32
    %1 = arith.extui %0 : i1 to i32
    %c0_i32_0 = arith.constant 0 : i32
    %2 = arith.cmpi ne, %1, %c0_i32_0 : i32
    scf.if %2 {
      %cst_12 = arith.constant 0.000000e+00 : f32
      %16 = vector.broadcast %cst_12 : f32 to vector<128x8xf32>
      %c0_13 = arith.constant 0 : index
      %c0_14 = arith.constant 0 : index
      %17 = vector.load %arg9[%c0_13, %c0_14] : memref<128x8xf32, #tpu.memory_space<vmem>>, vector<128x8xf32>
      tpu.vector_store %arg9[%c0_13, %c0_14], %16 {strides = array<i32>} : memref<128x8xf32, #tpu.memory_space<vmem>>, vector<128x8xf32>,
    } else {
    }
    %c0 = arith.constant 0 : index
    %c0_1 = arith.constant 0 : index
    %3 = vector.load %arg2[%c0, %c0_1] : memref<128x128xi8, #tpu.memory_space<vmem>>, vector<128x128xi8>
    %4 = arith.sitofp %3 : vector<128x128xi8> to vector<128x128xbf16>
    %c0_2 = arith.constant 0 : index
    %c0_3 = arith.constant 0 : index
    %5 = vector.load %arg9[%c0_2, %c0_3] : memref<128x8xf32, #tpu.memory_space<vmem>>, vector<128x8xf32>
    %c0_4 = arith.constant 0 : index
    %c0_5 = arith.constant 0 : index
    %6 = vector.load %arg3[%c0_4, %c0_5] : memref<128x8xbf16, #tpu.memory_space<vmem>>, vector<128x8xbf16>
    %cst = arith.constant dense<0.000000e+00> : vector<128x8xf32>
    %7 = tpu.matmul %4, %6, %cst {dimension_numbers = #tpu.dot_dimension_numbers<[1], [0], [0], [1], [0, 0, 1, 1], [], []>} : vector<128x128xbf16>, vector<128x8xbf16>, vector<128x8xf32> -> vector<128x8xf32>
    %c0_6 = arith.constant 0 : index
    %c0_7 = arith.constant 0 : index
    %8 = vector.load %arg4[%c0_6, %c0_7] : memref<128x8xbf16, #tpu.memory_space<vmem>>, vector<128x8xbf16>
    %cst_8 = arith.constant dense<0.000000e+00> : vector<128x8xf32>
    %9 = tpu.matmul %4, %8, %cst_8 {dimension_numbers = #tpu.dot_dimension_numbers<[1], [0], [0], [1], [0, 0, 1, 1], [], []>} : vector<128x128xbf16>, vector<128x8xbf16>, vector<128x8xf32> -> vector<128x8xf32>
    %10 = arith.addf %7, %9 : vector<128x8xf32>
    %11 = arith.addf %5, %10 : vector<128x8xf32>
    %c0_9 = arith.constant 0 : index
    %c0_10 = arith.constant 0 : index
    %12 = vector.load %arg9[%c0_9, %c0_10] : memref<128x8xf32, #tpu.memory_space<vmem>>, vector<128x8xf32>
    tpu.vector_store %arg9[%c0_9, %c0_10], %11 {strides = array<i32>} : memref<128x8xf32, #tpu.memory_space<vmem>>, vector<128x8xf32>,
    %c1_i32 = arith.constant 1 : i32
    %13 = arith.cmpi eq, %arg1, %c1_i32 : i32
    %14 = arith.extui %13 : i1 to i32
    %c0_i32_11 = arith.constant 0 : i32
    %15 = arith.cmpi ne, %14, %c0_i32_11 : i32
    scf.if %15 {
      %c0_12 = arith.constant 0 : index
      %c0_13 = arith.constant 0 : index
      %16 = vector.load %arg9[%c0_12, %c0_13] : memref<128x8xf32, #tpu.memory_space<vmem>>, vector<128x8xf32>
      %c0_14 = arith.constant 0 : index
      %c0_15 = arith.constant 0 : index
      %17 = vector.load %arg5[%c0_14, %c0_15] : memref<128x1xf32, #tpu.memory_space<vmem>>, vector<128x1xf32>
      %18 = vector.broadcast %17 : vector<128x1xf32> to vector<128x8xf32>
      %19 = arith.mulf %16, %18 : vector<128x8xf32>
      %c0_16 = arith.constant 0 : index
      %c0_17 = arith.constant 0 : index
      %20 = vector.load %arg6[%c0_16, %c0_17] : memref<8x128xf32, #tpu.memory_space<vmem>>, vector<8x128xf32>
      %cst_18 = arith.constant dense<0.000000e+00> : vector<128x128xf32>
      %21 = tpu.matmul %19, %20, %cst_18 {dimension_numbers = #tpu.dot_dimension_numbers<[1], [0], [0], [1], [0, 0, 1, 1], [], []>} : vector<128x8xf32>, vector<8x128xf32>, vector<128x128xf32> -> vector<128x128xf32>
      %c0_19 = arith.constant 0 : index
      %c0_20 = arith.constant 0 : index
      %22 = vector.load %arg7[%c0_19, %c0_20] : memref<1x128xf32, #tpu.memory_space<vmem>>, vector<1x128xf32>
      %23 = vector.broadcast %22 : vector<1x128xf32> to vector<128x128xf32>
      %24 = arith.addf %21, %23 : vector<128x128xf32>
      %c0_21 = arith.constant 0 : index
      %c0_22 = arith.constant 0 : index
      %25 = vector.load %arg8[%c0_21, %c0_22] : memref<128x128xf32, #tpu.memory_space<vmem>>, vector<128x128xf32>
      tpu.vector_store %arg8[%c0_21, %c0_22], %24 {strides = array<i32>} : memref<128x128xf32, #tpu.memory_space<vmem>>, vector<128x128xf32>,
    } else {
    }
    return
  }
  func.func @transform_0(%arg0: i32, %arg1: i32) -> (i32, i32) {
    %c0_i32 = arith.constant 0 : i32
    return %arg0, %arg1 : i32, i32
  }
  func.func @transform_1(%arg0: i32, %arg1: i32) -> (i32, i32) {
    %c0_i32 = arith.constant 0 : i32
    %c0_i32_0 = arith.constant 0 : i32
    return %arg1, %c0_i32 : i32, i32
  }
  func.func @transform_2(%arg0: i32, %arg1: i32) -> (i32, i32) {
    %c0_i32 = arith.constant 0 : i32
    %c0_i32_0 = arith.constant 0 : i32
    return %arg1, %c0_i32 : i32, i32
  }
  func.func @transform_3(%arg0: i32, %arg1: i32) -> (i32, i32) {
    %c0_i32 = arith.constant 0 : i32
    %c0_i32_0 = arith.constant 0 : i32
    return %arg0, %c0_i32 : i32, i32
  }
  func.func @transform_4(%arg0: i32, %arg1: i32) -> (i32, i32) {
    %c0_i32 = arith.constant 0 : i32
    %c0_i32_0 = arith.constant 0 : i32
    %c0_i32_1 = arith.constant 0 : i32
    return %c0_i32, %c0_i32_0 : i32, i32
  }
  func.func @transform_5(%arg0: i32, %arg1: i32) -> (i32, i32) {
    %c0_i32 = arith.constant 0 : i32
    %c0_i32_0 = arith.constant 0 : i32
    %c0_i32_1 = arith.constant 0 : i32
    return %c0_i32, %c0_i32_0 : i32, i32
  }
  func.func @transform_6(%arg0: i32, %arg1: i32) -> (i32, i32) {
    %c0_i32 = arith.constant 0 : i32
    %c0_i32_0 = arith.constant 0 : i32
    return %arg0, %c0_i32 : i32, i32
  }
}

</mosaic_0001>

<bundles_post_ra>
// kernel: _gcn_call.1
= control target key start
LH: loop header
LB: loop body
LE: loop exit
PB: predicated region body
PF: predicated region fallthrough
CT: control target
= control target key end

     0   :  { %s1395_s21 = smov 0   ;;  %s1397_s22 = smov 0   ;;  %s1611_s0 = inlined_call_operand.vmem [shape: s8[256,256], index: 0, kind: input, shape index: {}]   ;;  %s1612_s1 = inlined_call_operand.vmem [shape: bf16[256,8], index: 1, kind: input, shape index: {}]   ;;  %s1613_s2 = inlined_call_operand.vmem [shape: bf16[256,8], index: 2, kind: input, shape index: {}]   ;;  %s1614_s3 = inlined_call_operand.vmem [shape: f32[256,1], index: 3, kind: input, shape index: {}]   ;;  %s1615_s4 = inlined_call_operand.vmem [shape: f32[8,128], index: 4, kind: input, shape index: {}]   ;;  %s1616_s5 = inlined_call_operand.vmem [shape: f32[1,128], index: 5, kind: input, shape index: {}]   ;;  %s1617_s6 = inlined_call_operand.vmem [shape: f32[256,128], index: 6, kind: output, shape index: {}]  }
   0x1   :  { %s1399_s23 = smov 0   ;;  %s1401_s24 = smov 0  }
   0x2   :  { %s1403_s25 = smov 0   ;;  %s1405_s26 = smov 0  }
   0x3   :  { %s1407_s27 = smov 0  }
   0x4 LB: > { %s25_s28 = sadd.s32 1, %s1348_s25  ;;  %s28_s29 = sadd.s32 1, %s1352_s26  ;;  %s1356_s27 = sphi %s1407_s27, %s16_s27   ;;  %s1352_s26 = sphi %s1405_s26, %s1623_s26   ;;  %s1348_s25 = sphi %s1403_s25, %s1622_s25   ;;  %s1344_s24 = sphi %s1401_s24, %s1621_s24   ;;  %s1340_s23 = sphi %s1399_s23, %s1620_s23   ;;  %s1336_s22 = sphi %s1397_s22, %s1619_s22   ;;  %s1332_s21 = sphi %s1395_s21, %s1618_s21  }
   0x5   : > { %p26_p0 = scmp.ge.s32.totalorder %s25_s28, 2  ;;  %p44_p1 = scmp.ne.s32.totalorder %s1336_s22, %s1332_s21 }
   0x6   : > { %p45_p2 = scmp.eq.s32.totalorder %s1356_s27, 0  ;;  %s37_s9 = sadd.s32 1, %s1336_s22 }
   0x7   : > { %s1625_s28 = smov (%p26_p0, %s25_s28), 0  ;;  %s1627_s29 = smov (!%p26_p0, %s28_s29), %s1352_s26 }
   0x8   : > { %p46_p3 = por %p45_p2, %p44_p1  ;;  %p30_p4 = scmp.ge.s32.totalorder %s1627_s29, 2 }
   0x9   : > { %s33_s30 = ssub.s32 %s1348_s25, %s1625_s28  ;;  %p1105_p6 = scmp.ge.s32.totalorder %s1356_s27, 4 }
   0xa   : > { %s1629_s29 = smov (%p30_p4, %s1627_s29), 0 }
   0xb   : > { %s32_s7 = ssub.s32 %s1352_s26, %s1629_s29  ;;  %222 = sbr.rel (%p1105_p6) target bundleno = 26 (0x1a), region = 24 }
   0xc   : > { %s34_s8 = sor.u32 %s33_s30, %s32_s7 }
   0xd   : > { %p35_p5 = scmp.eq.s32.totalorder %s34_s8, 0 }
   0xf   : > { %s1446_s10 = scalar_select %p35_p5, %s1336_s22, %s37_s9  }
  0x10   : > { %225 = sbr.rel (!%p46_p3) target bundleno = 26 (0x1a), region = 28  ;;  %s227_s11 = sand.u32 (%p46_p3), 1, %s1336_s22  }
  0x11   : > { %s1204_s12 = sshll.u32 (%p46_p3), %s1352_s26, 3  ;;  %s1106_s13 = sshll.u32 (%p46_p3), %s227_s11, 5 }
  0x12   : > { %s232_s14 = sadd.s32 (%p46_p3), %s1348_s25, %s1204_s12  ;;  %s229_s19 = scalar_lea.vmem (%p46_p3), [#allocation3], %s1106_s13 }
  0x13   : > { %s1109_s15 = sshll.u32 (%p46_p3), %s232_s14, 3 }
  0x14   : > { %s234_s18 = scalar_lea.vmem (%p46_p3), %s1611_s0, %s1109_s15 }
  0x15   : > { %v269_v0 = vld [vmem:[%s234_s18] sm:$0xff]  ;;  %v271_v1 = vld [vmem:[%s234_s18 + $0x10] sm:$0xff] }
  0x16   : > { %v273_v2 = vld [vmem:[%s234_s18 + $0x20] sm:$0xff]  ;;  %270 = vst [vmem:[%s229_s19] sm:$0xff] %v269_v0  ;;  %v275_v3 = vld [vmem:[%s234_s18 + $0x30] sm:$0xff] }
  0x17   : > { %272 = vst [vmem:[%s229_s19 + $0x8] sm:$0xff] %v271_v1 }
  0x18   : > { %274 = vst [vmem:[%s229_s19 + $0x10] sm:$0xff] %v273_v2 }
  0x19   : > { %276 = vst [vmem:[%s229_s19 + $0x18] sm:$0xff] %v275_v3 }
  0x1a PF: > { %p1110_p7 = scmp.ge.s32.totalorder %s1356_s27, 1  ;;  %p308_p8 = scmp.lt.s32.totalorder %s1356_s27, 5 }
  0x1c   : > { %p309_p9 = pnand %p1110_p7, %p308_p8 }
  0x1d   : > { %s315_s20 = sand.u32 (!%p309_p9), 1, %s1332_s21   ;;  %s1112_s30 = sshll.u32 (!%p309_p9), %s1340_s23, 4 }
  0x1e   : > { %312 = sbr.rel (%p309_p9) target bundleno = 576 (0x240), region = 78  ;;  %s1111_s7 = sshll.u32 (!%p309_p9), %s315_s20, 5 }
  0x1f   : > { %p361_p10 = scmp.lt.s32.totalorder (!%p309_p9), %s1112_s30, 31  ;;  %s1116_s8 = sshll.u32 (!%p309_p9), %s1344_s24, 4 }
  0x20   : > { %p373_p11 = scmp.lt.s32.totalorder (!%p309_p9), %s1116_s8, 31  ;;  %s1480_s11 = scalar_lea.vmem (!%p309_p9), [#allocation3], %s1111_s7 }
  0x21   : > { %p1120_p12 = scmp.ne.s32.totalorder (!%p309_p9), %s1340_s23, 0 }
  0x23   : > { %s1631_s30 = smov (!%p361_p10, %s1112_s30), 31  ;;  %s1633_s8 = smov (!%p373_p11, %s1116_s8), 31 }
  0x24   : > { %s1113_s9 = sshll.u32 %s1631_s30, 2  ;;  %s1117_s17 = sshll.u32 %s1633_s8, 3 }
  0x25   : > { %s1463_s13 = scalar_lea.vmem %s1612_s1, %s1113_s9  ;;  %s1468_s16 = scalar_lea.vmem %s1613_s2, %s1113_s9 }
  0x26   : > { %s1473_s19 = scalar_lea.vmem %s1614_s3, %s1117_s17  ;;  %s1478_s30 = scalar_lea.vmem %s1617_s6, %s1117_s17 }
  0x27   : > { %387 = sbr.rel (%p1120_p12) target bundleno = 61 (0x3d), region = 86 }
  0x2c   : > { %vm388_vm0 = vcmask 64512   ;;  %v1358_v4 = vmov 0.0  }
  0x2d   : > { %389 = vst.msk [vmem:[#allocation2] sm:$0xff] %vm388_vm0, %v1358_v4 }
  0x2e   : > { %390 = vst.msk [vmem:[#allocation2 + $0x8] sm:$0xff] %vm388_vm0, %v1358_v4 }
  0x2f   : > { %391 = vst.msk [vmem:[#allocation2 + $0x10] sm:$0xff] %vm388_vm0, %v1358_v4 }
  0x30   : > { %392 = vst.msk [vmem:[#allocation2 + $0x18] sm:$0xff] %vm388_vm0, %v1358_v4 }
  0x31   : > { %393 = vst.msk [vmem:[#allocation2 + $0x20] sm:$0xff] %vm388_vm0, %v1358_v4 }
  0x32   : > { %394 = vst.msk [vmem:[#allocation2 + $0x28] sm:$0xff] %vm388_vm0, %v1358_v4 }
  0x33   : > { %395 = vst.msk [vmem:[#allocation2 + $0x30] sm:$0xff] %vm388_vm0, %v1358_v4 }
  0x34   : > { %396 = vst.msk [vmem:[#allocation2 + $0x38] sm:$0xff] %vm388_vm0, %v1358_v4 }
  0x35   : > { %397 = vst.msk [vmem:[#allocation2 + $0x40] sm:$0xff] %vm388_vm0, %v1358_v4 }
  0x36   : > { %398 = vst.msk [vmem:[#allocation2 + $0x48] sm:$0xff] %vm388_vm0, %v1358_v4 }
  0x37   : > { %399 = vst.msk [vmem:[#allocation2 + $0x50] sm:$0xff] %vm388_vm0, %v1358_v4 }
  0x38   : > { %400 = vst.msk [vmem:[#allocation2 + $0x58] sm:$0xff] %vm388_vm0, %v1358_v4 }
  0x39   : > { %401 = vst.msk [vmem:[#allocation2 + $0x60] sm:$0xff] %vm388_vm0, %v1358_v4 }
  0x3a   : > { %402 = vst.msk [vmem:[#allocation2 + $0x68] sm:$0xff] %vm388_vm0, %v1358_v4 }
  0x3b   : > { %403 = vst.msk [vmem:[#allocation2 + $0x70] sm:$0xff] %vm388_vm0, %v1358_v4 }
  0x3c   : > { %404 = vst.msk [vmem:[#allocation2 + $0x78] sm:$0xff] %vm388_vm0, %v1358_v4 }
  0x3d PF: > { %v1220_v5 = vld [vmem:[%s1468_s16 + $0x38] sm:$0xff]  ;;  %v1219_v7 = vld [vmem:[%s1468_s16 + $0x30] sm:$0xff]  ;;  %v1218_v9 = vld [vmem:[%s1468_s16 + $0x28] sm:$0xff]  ;;  %vm707_vm1 = vcmask 64512   ;;  %p1185_p13 = scmp.ne.s32.totalorder %s1340_s23, 1 }
  0x3e   : > { %v1212_v6 = vld [vmem:[%s1463_s13 + $0x38] sm:$0xff]  ;;  %545 = vmatpush.bf16.msra.mxu0 %v1220_v5  ;;  %1221 = vmatpush.bf16.msra.mxu2 %v1220_v5  ;;  %v1211_v8 = vld [vmem:[%s1463_s13 + $0x30] sm:$0xff]  ;;  %v1210_v10 = vld [vmem:[%s1463_s13 + $0x28] sm:$0xff] }
  0x3f   : > { %642 = vmatpush.bf16.msra.mxu1 %v1212_v6  ;;  %1229 = vmatpush.bf16.msra.mxu3 %v1212_v6  ;;  %v1217_v11 = vld [vmem:[%s1468_s16 + $0x20] sm:$0xff]  ;;  %v1216_v13 = vld [vmem:[%s1468_s16 + $0x18] sm:$0xff]  ;;  %v1215_v15 = vld [vmem:[%s1468_s16 + $0x10] sm:$0xff] }
  0x40   : > { %v1209_v12 = vld [vmem:[%s1463_s13 + $0x20] sm:$0xff]  ;;  %v1208_v14 = vld [vmem:[%s1463_s13 + $0x18] sm:$0xff]  ;;  %v407_v17 = vld [vmem:[%s1480_s11 + $0x10] sm:$0xff] }
  0x41   : > { %v405_v16 = vld [vmem:[%s1480_s11] sm:$0xff]  ;;  %v1207_v18 = vld [vmem:[%s1463_s13 + $0x10] sm:$0xff]  ;;  %v417_v21 = vunpack.c.0.s8 %v407_v17  ;;  %v418_v22 = vunpack.c.1.s8 %v407_v17  ;;  %v1214_v23 = vld [vmem:[%s1468_s16 + $0x8] sm:$0xff]  ;;  %v419_v35 = vunpack.c.2.s8 %v407_v17  ;;  %v420_v36 = vunpack.c.3.s8 %v407_v17 }
  0x42   : > { %546 = vmatpush.bf16.msra.mxu0 %v1219_v7  ;;  %1222 = vmatpush.bf16.msra.mxu2 %v1219_v7  ;;  %v409_v19 = vunpack.c.0.s8 %v405_v16  ;;  %v410_v20 = vunpack.c.1.s8 %v405_v16  ;;  %v1206_v24 = vld [vmem:[%s1463_s13 + $0x8] sm:$0xff]  ;;  %v1213_v29 = vld [vmem:[%s1468_s16] sm:$0xff]  ;;  %v411_v33 = vunpack.c.2.s8 %v405_v16  ;;  %v412_v34 = vunpack.c.3.s8 %v405_v16  ;;  %v408_v44 = vld [vmem:[%s1480_s11 + $0x18] sm:$0xff] }
  0x43   : > { %643 = vmatpush.bf16.msra.mxu1 %v1211_v8  ;;  %1230 = vmatpush.bf16.msra.mxu3 %v1211_v8  ;;  %v433_v27 = vcvt.s32.f32 %v417_v21  ;;  %v434_v28 = vcvt.s32.f32 %v418_v22  ;;  %v1205_v30 = vld [vmem:[%s1463_s13] sm:$0xff]  ;;  %v435_v39 = vcvt.s32.f32 %v419_v35  ;;  %v436_v40 = vcvt.s32.f32 %v420_v36  ;;  %v406_v43 = vld [vmem:[%s1480_s11 + $0x8] sm:$0xff]  ;;  %v451_v21 = vld [vmem:[#allocation2 + $0x10] sm:$0xff] }
  0x44   : > { %v425_v25 = vcvt.s32.f32 %v409_v19  ;;  %v426_v26 = vcvt.s32.f32 %v410_v20  ;;  %v427_v37 = vcvt.s32.f32 %v411_v33  ;;  %v428_v38 = vcvt.s32.f32 %v412_v34  ;;  %v449_v2 = vld [vmem:[#allocation2] sm:$0xff]  ;;  %v458_v17 = vld [vmem:[#allocation2 + $0x48] sm:$0xff] }
  0x45   : > { %v445_v32 = vpack.c.bf16 %v434_v28, %v433_v27  ;;  %v446_v42 = vpack.c.bf16 %v436_v40, %v435_v39  ;;  %v413_v45 = vunpack.c.0.s8 %v406_v43  ;;  %v414_v46 = vunpack.c.1.s8 %v406_v43  ;;  %v457_v7 = vld [vmem:[#allocation2 + $0x40] sm:$0xff]  ;;  %v459_v27 = vld [vmem:[#allocation2 + $0x50] sm:$0xff] }
  0x46   : > { %547 = vmatpush.bf16.msra.mxu0 %v1218_v9  ;;  %1223 = vmatpush.bf16.msra.mxu2 %v1218_v9  ;;  %v441_v31 = vpack.c.bf16 %v426_v26, %v425_v25  ;;  %v442_v41 = vpack.c.bf16 %v428_v38, %v427_v37  ;;  %v421_v47 = vunpack.c.0.s8 %v408_v44  ;;  %v422_v48 = vunpack.c.1.s8 %v408_v44  ;;  %v460_v37 = vld [vmem:[#allocation2 + $0x58] sm:$0xff] }
  0x47   : > { %644 = vmatpush.bf16.msra.mxu1 %v1210_v10  ;;  %1231 = vmatpush.bf16.msra.mxu3 %v1210_v10  ;;  %v429_v49 = vcvt.s32.f32 %v413_v45  ;;  %v430_v50 = vcvt.s32.f32 %v414_v46  ;;  %v415_v55 = vunpack.c.2.s8 %v406_v43  ;;  %v416_v56 = vunpack.c.3.s8 %v406_v43 }
  0x48   : > { %v437_v51 = vcvt.s32.f32 %v421_v47  ;;  %v438_v52 = vcvt.s32.f32 %v422_v48  ;;  %v423_v57 = vunpack.c.2.s8 %v408_v44  ;;  %v424_v58 = vunpack.c.3.s8 %v408_v44  ;;  %v461_v47 = vld [vmem:[#allocation2 + $0x60] sm:$0xff] }
  0x49   : > { %v443_v53 = vpack.c.bf16 %v430_v50, %v429_v49  ;;  %v431_v59 = vcvt.s32.f32 %v415_v55  ;;  %v432_v60 = vcvt.s32.f32 %v416_v56 }
  0x4a   : > { %548 = vmatpush.bf16.msra.mxu0 %v1217_v11  ;;  %1224 = vmatpush.bf16.msra.mxu2 %v1217_v11  ;;  %v447_v54 = vpack.c.bf16 %v438_v52, %v437_v51  ;;  %v439_v61 = vcvt.s32.f32 %v423_v57  ;;  %v440_v62 = vcvt.s32.f32 %v424_v58  ;;  %v450_v11 = vld [vmem:[#allocation2 + $0x8] sm:$0xff] }
  0x4b   : > { %645 = vmatpush.bf16.msra.mxu1 %v1209_v12  ;;  %1232 = vmatpush.bf16.msra.mxu3 %v1209_v12  ;;  %v444_v63 = vpack.c.bf16 %v432_v60, %v431_v59  ;;  %v454_v51 = vld [vmem:[#allocation2 + $0x28] sm:$0xff] }
  0x4c   : > { %v448_v0 = vpack.c.bf16 %v440_v62, %v439_v61  ;;  %v462_v57 = vld [vmem:[#allocation2 + $0x68] sm:$0xff]  ;;  %v455_v61 = vld [vmem:[#allocation2 + $0x30] sm:$0xff] }
  0x4e   : > { %549 = vmatpush.bf16.msra.mxu0 %v1216_v13  ;;  %1225 = vmatpush.bf16.msra.mxu2 %v1216_v13 }
  0x4f   : > { %646 = vmatpush.bf16.msra.mxu1 %v1208_v14  ;;  %1233 = vmatpush.bf16.msra.mxu3 %v1208_v14 }
  0x52   : > { %550 = vmatpush.bf16.msra.mxu0 %v1215_v15  ;;  %1226 = vmatpush.bf16.msra.mxu2 %v1215_v15 }
  0x53   : > { %647 = vmatpush.bf16.msra.mxu1 %v1207_v18  ;;  %1234 = vmatpush.bf16.msra.mxu3 %v1207_v18 }
  0x56   : > { %551 = vmatpush.bf16.msra.mxu0 %v1214_v23  ;;  %1227 = vmatpush.bf16.msra.mxu2 %v1214_v23 }
  0x57   : > { %648 = vmatpush.bf16.msra.mxu1 %v1206_v24  ;;  %1235 = vmatpush.bf16.msra.mxu3 %v1206_v24 }
  0x5a   : > { %552 = vmatpush.bf16.msra.mxu0 %v1213_v29  ;;  %1228 = vmatpush.bf16.msra.mxu2 %v1213_v29 }
  0x5b   : > { %649 = vmatpush.bf16.msra.mxu1 %v1205_v30  ;;  %1236 = vmatpush.bf16.msra.mxu3 %v1205_v30 }
  0x5d   : > { %553 = vmatmul.bf16.vlgmr.msra.gmra.mxu0 %v441_v31  ;;  %573 = vmatmul.bf16.vlgmr.msra.gmra.mxu2 %v445_v32 }
  0x5e   : > { %650 = vmatmul.bf16.vlgmr.msra.gmra.mxu1 %v441_v31  ;;  %670 = vmatmul.bf16.vlgmr.msra.gmra.mxu3 %v445_v32  ;;  %v452_v31 = vld [vmem:[#allocation2 + $0x18] sm:$0xff] }
  0x6d   : > { %558 = vmatmul.bf16.gmra.mxu0 %v442_v41  ;;  %578 = vmatmul.bf16.gmra.mxu2 %v446_v42 }
  0x6e   : > { %655 = vmatmul.bf16.gmra.mxu1 %v442_v41  ;;  %675 = vmatmul.bf16.gmra.mxu3 %v446_v42  ;;  %v453_v41 = vld [vmem:[#allocation2 + $0x20] sm:$0xff] }
  0x7d   : > { %563 = vmatmul.bf16.gmra.mxu0 %v443_v53  ;;  %583 = vmatmul.bf16.gmra.mxu2 %v447_v54 }
  0x7e   : > { %660 = vmatmul.bf16.gmra.mxu1 %v443_v53  ;;  %680 = vmatmul.bf16.gmra.mxu3 %v447_v54 }
  0x8d   : > { %568 = vmatmul.bf16.gmra.mxu0 %v444_v63  ;;  %588 = vmatmul.bf16.gmra.mxu2 %v448_v0 }
  0x8e   : > { %665 = vmatmul.bf16.gmra.mxu1 %v444_v63  ;;  %685 = vmatmul.bf16.gmra.mxu3 %v448_v0 }
  0xda   : > { %v554_v1 = vpop.f32.mrf.mxu0 }
  0xdb   : > { %v651_v3 = vpop.f32.mrf.mxu1 }
  0xdc   : > { %v652_v4 = vadd.f32 %v651_v3, %v554_v1  ;;  %v463_v3 = vld [vmem:[#allocation2 + $0x70] sm:$0xff] }
  0xde   : > { %v691_v5 = vadd.f32 %v652_v4, %v449_v2 }
  0xe0   : > { %708 = vst.msk [vmem:[#allocation2] sm:$0xff] %vm707_vm1, %v691_v5  ;;  %v574_v6 = vpop.f32.mrf.mxu2 }
  0xe1   : > { %v671_v8 = vpop.f32.mrf.mxu3 }
  0xe2   : > { %v672_v9 = vadd.f32 %v671_v8, %v574_v6  ;;  %v556_v10 = vpop.f32.mrf.mxu0 }
  0xe3   : > { %v653_v12 = vpop.f32.mrf.mxu1 }
  0xe4   : > { %v699_v13 = vadd.f32 %v672_v9, %v457_v7  ;;  %v654_v14 = vadd.f32 %v653_v12, %v556_v10  ;;  %v456_v7 = vld [vmem:[#allocation2 + $0x38] sm:$0xff] }
  0xe6   : > { %716 = vst.msk [vmem:[#allocation2 + $0x40] sm:$0xff] %vm707_vm1, %v699_v13  ;;  %v692_v15 = vadd.f32 %v654_v14, %v450_v11  ;;  %v464_v13 = vld [vmem:[#allocation2 + $0x78] sm:$0xff] }
  0xe8   : > { %709 = vst.msk [vmem:[#allocation2 + $0x8] sm:$0xff] %vm707_vm1, %v692_v15  ;;  %v576_v16 = vpop.f32.mrf.mxu2 }
  0xe9   : > { %v673_v18 = vpop.f32.mrf.mxu3 }
  0xea   : > { %v674_v19 = vadd.f32 %v673_v18, %v576_v16  ;;  %v559_v20 = vpop.f32.mrf.mxu0 }
  0xeb   : > { %v656_v22 = vpop.f32.mrf.mxu1 }
  0xec   : > { %v700_v23 = vadd.f32 %v674_v19, %v458_v17  ;;  %v657_v24 = vadd.f32 %v656_v22, %v559_v20 }
  0xee   : > { %717 = vst.msk [vmem:[#allocation2 + $0x48] sm:$0xff] %vm707_vm1, %v700_v23  ;;  %v693_v25 = vadd.f32 %v657_v24, %v451_v21 }
  0xf0   : > { %710 = vst.msk [vmem:[#allocation2 + $0x10] sm:$0xff] %vm707_vm1, %v693_v25  ;;  %v579_v26 = vpop.f32.mrf.mxu2 }
  0xf1   : > { %v676_v28 = vpop.f32.mrf.mxu3 }
  0xf2   : > { %v677_v29 = vadd.f32 %v676_v28, %v579_v26  ;;  %v561_v30 = vpop.f32.mrf.mxu0 }
  0xf3   : > { %v658_v32 = vpop.f32.mrf.mxu1 }
  0xf4   : > { %v701_v33 = vadd.f32 %v677_v29, %v459_v27  ;;  %v659_v34 = vadd.f32 %v658_v32, %v561_v30 }
  0xf6   : > { %718 = vst.msk [vmem:[#allocation2 + $0x50] sm:$0xff] %vm707_vm1, %v701_v33  ;;  %v694_v35 = vadd.f32 %v659_v34, %v452_v31 }
  0xf8   : > { %711 = vst.msk [vmem:[#allocation2 + $0x18] sm:$0xff] %vm707_vm1, %v694_v35  ;;  %v581_v36 = vpop.f32.mrf.mxu2 }
  0xf9   : > { %v678_v38 = vpop.f32.mrf.mxu3 }
  0xfa   : > { %v679_v39 = vadd.f32 %v678_v38, %v581_v36  ;;  %v564_v40 = vpop.f32.mrf.mxu0 }
  0xfb   : > { %v661_v42 = vpop.f32.mrf.mxu1 }
  0xfc   : > { %v702_v43 = vadd.f32 %v679_v39, %v460_v37  ;;  %v662_v44 = vadd.f32 %v661_v42, %v564_v40 }
  0xfe   : > { %719 = vst.msk [vmem:[#allocation2 + $0x58] sm:$0xff] %vm707_vm1, %v702_v43  ;;  %v695_v45 = vadd.f32 %v662_v44, %v453_v41 }
 0x100   : > { %712 = vst.msk [vmem:[#allocation2 + $0x20] sm:$0xff] %vm707_vm1, %v695_v45  ;;  %v584_v46 = vpop.f32.mrf.mxu2 }
 0x101   : > { %v681_v48 = vpop.f32.mrf.mxu3 }
 0x102   : > { %v682_v49 = vadd.f32 %v681_v48, %v584_v46  ;;  %v566_v50 = vpop.f32.mrf.mxu0 }
 0x103   : > { %v663_v52 = vpop.f32.mrf.mxu1 }
 0x104   : > { %v703_v53 = vadd.f32 %v682_v49, %v461_v47  ;;  %v664_v54 = vadd.f32 %v663_v52, %v566_v50 }
 0x106   : > { %720 = vst.msk [vmem:[#allocation2 + $0x60] sm:$0xff] %vm707_vm1, %v703_v53  ;;  %v696_v55 = vadd.f32 %v664_v54, %v454_v51 }
 0x108   : > { %713 = vst.msk [vmem:[#allocation2 + $0x28] sm:$0xff] %vm707_vm1, %v696_v55  ;;  %v586_v56 = vpop.f32.mrf.mxu2 }
 0x109   : > { %v683_v58 = vpop.f32.mrf.mxu3 }
 0x10a   : > { %v684_v59 = vadd.f32 %v683_v58, %v586_v56  ;;  %v569_v60 = vpop.f32.mrf.mxu0 }
 0x10b   : > { %v666_v62 = vpop.f32.mrf.mxu1 }
 0x10c   : > { %v704_v63 = vadd.f32 %v684_v59, %v462_v57  ;;  %v667_v0 = vadd.f32 %v666_v62, %v569_v60 }
 0x10e   : > { %721 = vst.msk [vmem:[#allocation2 + $0x68] sm:$0xff] %vm707_vm1, %v704_v63  ;;  %v697_v1 = vadd.f32 %v667_v0, %v455_v61 }
 0x110   : > { %714 = vst.msk [vmem:[#allocation2 + $0x30] sm:$0xff] %vm707_vm1, %v697_v1  ;;  %v589_v2 = vpop.f32.mrf.mxu2 }
 0x111   : > { %v686_v4 = vpop.f32.mrf.mxu3 }
 0x112   : > { %v687_v5 = vadd.f32 %v686_v4, %v589_v2  ;;  %v571_v6 = vpop.f32.mrf.mxu0 }
 0x113   : > { %v668_v8 = vpop.f32.mrf.mxu1 }
 0x114   : > { %v705_v9 = vadd.f32 %v687_v5, %v463_v3  ;;  %v669_v10 = vadd.f32 %v668_v8, %v571_v6 }
 0x116   : > { %722 = vst.msk [vmem:[#allocation2 + $0x70] sm:$0xff] %vm707_vm1, %v705_v9  ;;  %v698_v11 = vadd.f32 %v669_v10, %v456_v7 }
 0x118   : > { %715 = vst.msk [vmem:[#allocation2 + $0x38] sm:$0xff] %vm707_vm1, %v698_v11  ;;  %v591_v12 = vpop.f32.mrf.mxu2 }
 0x119   : > { %v688_v14 = vpop.f32.mrf.mxu3 }
 0x11a   : > { %v689_v15 = vadd.f32 %v688_v14, %v591_v12  ;;  %727 = sbr.rel (%p1185_p13) target bundleno = 576 (0x240), region = 90 }
 0x11c   : > { %v706_v16 = vadd.f32 %v689_v15, %v464_v13 }
 0x11e   : > { %723 = vst.msk [vmem:[#allocation2 + $0x78] sm:$0xff] %vm707_vm1, %v706_v16 }
 0x11f   : > { %v753_v17 = vld [vmem:[%s1473_s19 + $0x48] sm:$0xff]  ;;  %v752_v18 = vld [vmem:[%s1473_s19 + $0x40] sm:$0xff]  ;;  %v1359_v20 = vmov 0   ;;  %v754_v24 = vld [vmem:[%s1473_s19 + $0x50] sm:$0xff] }
 0x120   : > { %v744_v19 = vld [vmem:[%s1473_s19] sm:$0xff]  ;;  %1300 = vset.pattern.permute.xlu2 %v1359_v20  ;;  %1299 = vset.pattern.permute.xlu1 %v1359_v20  ;;  %v757_v21 = vld [vmem:[%s1473_s19 + $0x68] sm:$0xff]  ;;  %v750_v27 = vld [vmem:[%s1473_s19 + $0x30] sm:$0xff] }
 0x121   : > { %1298 = vset.pattern.permute.xlu0 %v1359_v20  ;;  %807 = vperm.xlu2 %1300, %v753_v17   ;;  %v756_v22 = vld [vmem:[%s1473_s19 + $0x60] sm:$0xff]  ;;  %v745_v25 = vld [vmem:[%s1473_s19 + $0x8] sm:$0xff]  ;;  %v758_v28 = vld [vmem:[%s1473_s19 + $0x70] sm:$0xff] }
 0x122   : > { %802 = vperm.xlu0 %1298, %v752_v18   ;;  %762 = vperm.xlu1 %1299, %v744_v19   ;;  %v748_v23 = vld [vmem:[%s1473_s19 + $0x20] sm:$0xff]  ;;  %v749_v26 = vld [vmem:[%s1473_s19 + $0x28] sm:$0xff]  ;;  %v746_v29 = vld [vmem:[%s1473_s19 + $0x10] sm:$0xff] }
 0x123   : > { %v747_v30 = vld [vmem:[%s1473_s19 + $0x18] sm:$0xff]  ;;  %v856_v34 = vld [vmem:[%s1615_s4] sm:$0xff]  ;;  %v737_v43 = vld [vmem:[#allocation2 + $0x48] sm:$0xff] }
 0x124   : > { %v755_v31 = vld [vmem:[%s1473_s19 + $0x58] sm:$0xff]  ;;  %1238 = vmatpush.msra.mxu2 %v856_v34  ;;  %924 = vmatpush.msra.mxu0 %v856_v34  ;;  %v736_v36 = vld [vmem:[#allocation2 + $0x40] sm:$0xff]  ;;  %v729_v52 = vld [vmem:[#allocation2 + $0x8] sm:$0xff] }
 0x125   : > { %v759_v32 = vld [vmem:[%s1473_s19 + $0x78] sm:$0xff]  ;;  %1237 = vmatpush.msra.mxu1 %v856_v34  ;;  %1239 = vmatpush.msra.mxu3 %v856_v34  ;;  %v728_v37 = vld [vmem:[#allocation2] sm:$0xff]  ;;  %v733_v53 = vld [vmem:[#allocation2 + $0x28] sm:$0xff] }
 0x126   : > { %v751_v33 = vld [vmem:[%s1473_s19 + $0x38] sm:$0xff]  ;;  %v740_v44 = vld [vmem:[#allocation2 + $0x60] sm:$0xff]  ;;  %v741_v54 = vld [vmem:[#allocation2 + $0x68] sm:$0xff] }
 0x127   : > { %v732_v45 = vld [vmem:[#allocation2 + $0x20] sm:$0xff]  ;;  %v738_v55 = vld [vmem:[#allocation2 + $0x50] sm:$0xff]  ;;  %v731_v8 = vld [vmem:[#allocation2 + $0x18] sm:$0xff] }
 0x128   : > { %v734_v63 = vld [vmem:[#allocation2 + $0x30] sm:$0xff]  ;;  %v739_v9 = vld [vmem:[#allocation2 + $0x58] sm:$0xff]  ;;  %v1301_v19 = vld [vmem:[%s1616_s5] ss:$0 sm:$0xff] }
 0x129   : > { %827 = vperm.xlu2 %1300, %v757_v21   ;;  %v742_v0 = vld [vmem:[#allocation2 + $0x70] sm:$0xff]  ;;  %v743_v10 = vld [vmem:[#allocation2 + $0x78] sm:$0xff] }
 0x12a   : > { %822 = vperm.xlu0 %1298, %v756_v22   ;;  %782 = vperm.xlu1 %1299, %v748_v23   ;;  %v730_v1 = vld [vmem:[#allocation2 + $0x10] sm:$0xff]  ;;  %v735_v16 = vld [vmem:[#allocation2 + $0x38] sm:$0xff] }
 0x131   : > { %812 = vperm.xlu2 %1300, %v754_v24  }
 0x132   : > { %767 = vperm.xlu0 %1298, %v745_v25   ;;  %787 = vperm.xlu1 %1299, %v749_v26  }
 0x139   : > { %792 = vperm.xlu2 %1300, %v750_v27  }
 0x13a   : > { %832 = vperm.xlu0 %1298, %v758_v28   ;;  %772 = vperm.xlu1 %1299, %v746_v29  }
 0x141   : > { %777 = vperm.xlu2 %1300, %v747_v30  }
 0x142   : > { %817 = vperm.xlu0 %1298, %v755_v31   ;;  %837 = vperm.xlu1 %1299, %v759_v32  }
 0x14a   : > { %797 = vperm.xlu0 %1298, %v751_v33  }
 0x17b   : > { %v808_v35 = vpop.permute.xlu2 %807 }
 0x17c   : > { %v849_v46 = vmul.f32 %v808_v35, %v737_v43 }
 0x183   : > { %v828_v38 = vpop.permute.xlu2 %827 }
 0x184   : > { %v853_v60 = vmul.f32 %v828_v38, %v741_v54 }
 0x18b   : > { %v813_v51 = vpop.permute.xlu2 %812 }
 0x18c   : > { %v850_v61 = vmul.f32 %v813_v51, %v738_v55 }
 0x193   : > { %v793_v62 = vpop.permute.xlu2 %792 }
 0x194   : > { %v803_v39 = vpop.permute.xlu0 %802  ;;  %v763_v40 = vpop.permute.xlu1 %762  ;;  %v846_v4 = vmul.f32 %v793_v62, %v734_v63 }
 0x195   : > { %v848_v41 = vmul.f32 %v803_v39, %v736_v36  ;;  %v840_v42 = vmul.f32 %v763_v40, %v728_v37 }
 0x197   : > { %1194 = vmatmul.msk.f32.vlgmr.msra.gmra.mxu2 %vm707_vm1, %v848_v41  ;;  %1186 = vmatmul.msk.f32.vlgmr.msra.gmra.mxu0 %vm707_vm1, %v840_v42 }
 0x19b   : > { %v778_v7 = vpop.permute.xlu2 %777 }
 0x19c   : > { %v823_v47 = vpop.permute.xlu0 %822  ;;  %v783_v48 = vpop.permute.xlu1 %782  ;;  %v843_v13 = vmul.f32 %v778_v7, %v731_v8 }
 0x19d   : > { %v852_v49 = vmul.f32 %v823_v47, %v740_v44  ;;  %v844_v50 = vmul.f32 %v783_v48, %v732_v45 }
 0x19f   : > { %1190 = vmatmul.msk.f32.vlgmr.msra.gmra.mxu1 %vm707_vm1, %v844_v50  ;;  %1195 = vmatmul.msk.f32.gmra.mxu2 %vm707_vm1, %v849_v46 }
 0x1a0   : > { %1198 = vmatmul.msk.f32.vlgmr.msra.gmra.mxu3 %vm707_vm1, %v852_v49 }
 0x1a4   : > { %v768_v56 = vpop.permute.xlu0 %767  ;;  %v788_v57 = vpop.permute.xlu1 %787 }
 0x1a5   : > { %v841_v58 = vmul.f32 %v768_v56, %v729_v52  ;;  %v845_v59 = vmul.f32 %v788_v57, %v733_v53 }
 0x1a7   : > { %1187 = vmatmul.msk.f32.gmra.mxu0 %vm707_vm1, %v841_v58  ;;  %1191 = vmatmul.msk.f32.gmra.mxu1 %vm707_vm1, %v845_v59 }
 0x1a8   : > { %1196 = vmatmul.msk.f32.gmra.mxu2 %vm707_vm1, %v850_v61  ;;  %1199 = vmatmul.msk.f32.gmra.mxu3 %vm707_vm1, %v853_v60 }
 0x1ac   : > { %v833_v2 = vpop.permute.xlu0 %832  ;;  %v773_v3 = vpop.permute.xlu1 %772 }
 0x1ad   : > { %v854_v5 = vmul.f32 %v833_v2, %v742_v0  ;;  %v842_v6 = vmul.f32 %v773_v3, %v730_v1 }
 0x1af   : > { %1188 = vmatmul.msk.f32.gmra.mxu0 %vm707_vm1, %v842_v6  ;;  %1192 = vmatmul.msk.f32.gmra.mxu1 %vm707_vm1, %v846_v4 }
 0x1b0   : > { %1200 = vmatmul.msk.f32.gmra.mxu3 %vm707_vm1, %v854_v5 }
 0x1b4   : > { %v818_v11 = vpop.permute.xlu0 %817  ;;  %v838_v12 = vpop.permute.xlu1 %837 }
 0x1b5   : > { %v851_v14 = vmul.f32 %v818_v11, %v739_v9  ;;  %v855_v15 = vmul.f32 %v838_v12, %v743_v10 }
 0x1b7   : > { %1189 = vmatmul.msk.f32.gmra.mxu0 %vm707_vm1, %v843_v13  ;;  %1197 = vmatmul.msk.f32.gmra.mxu2 %vm707_vm1, %v851_v14 }
 0x1b8   : > { %1201 = vmatmul.msk.f32.gmra.mxu3 %vm707_vm1, %v855_v15 }
 0x1bc   : > { %v798_v17 = vpop.permute.xlu0 %797 }
 0x1bd   : > { %v847_v18 = vmul.f32 %v798_v17, %v735_v16 }
 0x1bf   : > { %1193 = vmatmul.msk.f32.gmra.mxu1 %vm707_vm1, %v847_v18 }
 0x214   : > { %v926_v20 = vpop.f32.mrf.mxu0 }
 0x215   : > { %v927_v21 = vadd.f32 %v1301_v19, %v926_v20 }
 0x217   : > { %974 = vst [vmem:[%s1478_s30] sm:$0xff] %v927_v21 }
 0x21a   : > { %v950_v22 = vpop.f32.mrf.mxu2 }
 0x21b   : > { %v951_v23 = vadd.f32 %v1301_v19, %v950_v22 }
 0x21c   : > { %v938_v24 = vpop.f32.mrf.mxu1 }
 0x21d   : > { %982 = vst [vmem:[%s1478_s30 + $0x40] sm:$0xff] %v951_v23  ;;  %v939_v25 = vadd.f32 %v1301_v19, %v938_v24 }
 0x21f   : > { %978 = vst [vmem:[%s1478_s30 + $0x20] sm:$0xff] %v939_v25 }
 0x222   : > { %v953_v26 = vpop.f32.mrf.mxu2 }
 0x223   : > { %v954_v27 = vadd.f32 %v1301_v19, %v953_v26  ;;  %v962_v28 = vpop.f32.mrf.mxu3 }
 0x224   : > { %v963_v29 = vadd.f32 %v1301_v19, %v962_v28  ;;  %v929_v30 = vpop.f32.mrf.mxu0  ;;  %v941_v31 = vpop.f32.mrf.mxu1 }
 0x225   : > { %983 = vst [vmem:[%s1478_s30 + $0x48] sm:$0xff] %v954_v27  ;;  %v930_v32 = vadd.f32 %v1301_v19, %v929_v30  ;;  %v942_v33 = vadd.f32 %v1301_v19, %v941_v31 }
 0x226   : > { %986 = vst [vmem:[%s1478_s30 + $0x60] sm:$0xff] %v963_v29 }
 0x227   : > { %975 = vst [vmem:[%s1478_s30 + $0x8] sm:$0xff] %v930_v32 }
 0x228   : > { %979 = vst [vmem:[%s1478_s30 + $0x28] sm:$0xff] %v942_v33 }
 0x22b   : > { %v956_v34 = vpop.f32.mrf.mxu2  ;;  %v965_v35 = vpop.f32.mrf.mxu3 }
 0x22c   : > { %v957_v36 = vadd.f32 %v1301_v19, %v956_v34  ;;  %v966_v37 = vadd.f32 %v1301_v19, %v965_v35  ;;  %v932_v38 = vpop.f32.mrf.mxu0  ;;  %v944_v39 = vpop.f32.mrf.mxu1 }
 0x22d   : > { %v933_v40 = vadd.f32 %v1301_v19, %v932_v38  ;;  %v945_v41 = vadd.f32 %v1301_v19, %v944_v39 }
 0x22e   : > { %984 = vst [vmem:[%s1478_s30 + $0x50] sm:$0xff] %v957_v36 }
 0x22f   : > { %987 = vst [vmem:[%s1478_s30 + $0x68] sm:$0xff] %v966_v37 }
 0x230   : > { %976 = vst [vmem:[%s1478_s30 + $0x10] sm:$0xff] %v933_v40 }
 0x231   : > { %980 = vst [vmem:[%s1478_s30 + $0x30] sm:$0xff] %v945_v41 }
 0x233   : > { %v968_v42 = vpop.f32.mrf.mxu3 }
 0x234   : > { %v969_v43 = vadd.f32 %v1301_v19, %v968_v42  ;;  %v935_v44 = vpop.f32.mrf.mxu0 }
 0x235   : > { %v936_v45 = vadd.f32 %v1301_v19, %v935_v44 }
 0x236   : > { %988 = vst [vmem:[%s1478_s30 + $0x70] sm:$0xff] %v969_v43 }
 0x237   : > { %977 = vst [vmem:[%s1478_s30 + $0x18] sm:$0xff] %v936_v45 }
 0x23a   : > { %v959_v46 = vpop.f32.mrf.mxu2 }
 0x23b   : > { %v960_v47 = vadd.f32 %v1301_v19, %v959_v46  ;;  %v971_v48 = vpop.f32.mrf.mxu3 }
 0x23c   : > { %v972_v49 = vadd.f32 %v1301_v19, %v971_v48  ;;  %v947_v50 = vpop.f32.mrf.mxu1 }
 0x23d   : > { %985 = vst [vmem:[%s1478_s30 + $0x58] sm:$0xff] %v960_v47  ;;  %v948_v51 = vadd.f32 %v1301_v19, %v947_v50 }
 0x23e   : > { %989 = vst [vmem:[%s1478_s30 + $0x78] sm:$0xff] %v972_v49 }
 0x23f   : > { %981 = vst [vmem:[%s1478_s30 + $0x38] sm:$0xff] %v948_v51 }
 0x240 PF: > { %s16_s27 = sadd.s32 1, %s1356_s27   ;;  %s1618_s21 = smov %s1336_s22 }
 0x241   : > { %p13_p0 = scmp.ge.s32.totalorder %s16_s27, 6   ;;  %s1619_s22 = smov %s1446_s10 }
 0x242   : > { %s1620_s23 = smov %s1348_s25  ;;  %s1621_s24 = smov %s1352_s26 }
 0x243   : > { %s1622_s25 = smov %s1625_s28  ;;  %s1623_s26 = smov %s1629_s29 }
 0x244   :  { %15 = sbr.rel (!%p13_p0) target bundleno = 4 (0x4), region = 134 }

</bundles_post_ra>
